<compile_context>
chip_gen: v5e
topology: v5e:2x2
jax: 0.10.0
libtpu: 0.0.40
codegen_flags: <defaults>
</compile_context>

<pallas_src>
import numpy as np
import jax
import jax.numpy as jnp
from jax import lax
from jax.experimental import pallas as pl
from jax.experimental.pallas import tpu as pltpu


# ----------------------------- Pallas kernel --------------------------------
def _gru_kernel(lens_ref, emb_ref, wih_ref, bi_ref, whh_ref, bhn_ref,
                wout_ref, bout_ref, out_ref, hfin_ref, gi_ref):
    B = lens_ref.shape[0]
    TB = emb_ref.shape[0]
    T = TB // B
    H = whh_ref.shape[0]

    # --- input-gate projections for all timesteps: one big MXU matmul,
    #     hoisted off the serial recurrence path (biases for r/z and b_in
    #     already folded into bi_ref) ---
    gi_ref[...] = (
        jnp.dot(emb_ref[...], wih_ref[...], preferred_element_type=jnp.float32)
        + bi_ref[...])

    lens = lens_ref[...]                          # [B, 1] int32 (hoisted)
    whh = whh_ref[...]                            # [H, 3H] bf16, gates [r|z|n]
    b_hn = bhn_ref[...]                           # [1, H] f32 (hoisted)

    def step(t, h):
        row = pl.multiple_of(t * B, B)            # sublane-aligned (B % 8 == 0)
        gi = gi_ref[pl.ds(row, B), :]             # [B, 3H] f32, this timestep
        # single fused hidden-gate matmul (3 dots -> 1)
        gh = jnp.dot(h.astype(whh.dtype), whh,
                     preferred_element_type=jnp.float32)      # [B, 3H]
        r = jax.nn.sigmoid(gi[:, :H] + gh[:, :H])
        z = jax.nn.sigmoid(gi[:, H:2 * H] + gh[:, H:2 * H])
        n = jnp.tanh(gi[:, 2 * H:] + r * (gh[:, 2 * H:] + b_hn))
        h_new = (1.0 - z) * n + z * h
        return jnp.where(t < lens, h_new, h)      # pack_padded_sequence masking

    h0 = jnp.zeros((B, H), jnp.float32)
    hf = lax.fori_loop(0, T, step, h0, unroll=(T <= 32))

    hfin_ref[...] = hf                            # final hidden (= last output)
    out_ref[...] = (
        jnp.dot(hf.astype(wout_ref.dtype), wout_ref[...],
                preferred_element_type=jnp.float32)
        + bout_ref[...])                          # Linear(hidden -> output)


# ------------------------------- wrapper -------------------------------------
def sentence_encoder_forward(inputs_list, params):
    """inputs_list: list of 1-D int32 token arrays (variable length)."""
    E = params["embedding"].shape[1]
    H = params["W_hh"].shape[1]
    O = params["W_out"].shape[0]

    B_real = len(inputs_list)
    lens = jnp.array([int(x.shape[0]) for x in inputs_list], dtype=jnp.int32)
    T = int(max(int(x.shape[0]) for x in inputs_list))
    B = ((B_real + 7) // 8) * 8                  # pad batch to 8 sublanes

    fwd = jnp.argsort(-lens)                     # descending-length order
    back = jnp.argsort(fwd)                      # inverse permutation

    pad = np.zeros((B_real, T), dtype=np.int32)  # pad_sequence(padding_value=0)
    for i, s in enumerate(inputs_list):
        pad[i, : s.shape[0]] = np.asarray(s)
    seq_sorted = jnp.asarray(pad)[fwd]           # [B_real, T]
    sorted_len = lens[fwd]

    # pad batch: extra rows are all-PAD tokens with length 0 -> hidden stays 0
    seq_sorted = jnp.pad(seq_sorted, ((0, B - B_real), (0, 0)))
    lens_pad = jnp.pad(sorted_len, (0, B - B_real)).astype(jnp.int32)

    emb = params["embedding"][seq_sorted]        # [B, T, E] embedding gather (glue)
    # TODO(synk): dropout is identity here (inference mode, no RNG mask applied)
    emb_2d = (jnp.transpose(emb, (1, 0, 2))      # [T, B, E] time-major
              .reshape(T * B, E)
              .astype(jnp.bfloat16))             # bf16 MXU inputs, f32 accum

    # Fused-gate operands (PyTorch layout: gates [r|z|n] along dim 0).
    W_ih, W_hh = params["W_ih"], params["W_hh"]  # [3H, E], [3H, H]
    b_ih, b_hh = params["b_ih"], params["b_hh"]
    W_ih_all = W_ih.T.astype(jnp.bfloat16)       # [E, 3H]
    W_hh_all = W_hh.T.astype(jnp.bfloat16)       # [H, 3H]
    b_i_all = jnp.concatenate(
        [b_ih[:H] + b_hh[:H],                    # r: both biases fold into GI
         b_ih[H:2 * H] + b_hh[H:2 * H],          # z: both biases fold into GI
         b_ih[2 * H:]])[None].astype(jnp.float32)          # [1, 3H]
    b_hn = b_hh[2 * H:][None].astype(jnp.float32)          # [1, H] stays in loop
    W_out = params["W_out"].T.astype(jnp.bfloat16)         # [H, O]
    b_out = params["b_out"][None].astype(jnp.float32)      # [1, O]

    vmem = pl.BlockSpec(memory_space=pltpu.MemorySpace.VMEM)

    out_pad, h_pad = pl.pallas_call(
        _gru_kernel,
        out_shape=(jax.ShapeDtypeStruct((B, O), jnp.float32),
                   jax.ShapeDtypeStruct((B, H), jnp.float32)),
        in_specs=[vmem] * 8,                     # whole (tiny) arrays in VMEM
        out_specs=(vmem, vmem),
        scratch_shapes=[pltpu.VMEM((T * B, 3 * H), jnp.float32)],  # GI scratch
    )(lens_pad[:, None], emb_2d, W_ih_all, b_i_all, W_hh_all, b_hn, W_out, b_out)

    outputs = out_pad[:B_real][back]   # drop batch padding, unsort (dropout=id)
    hiddens = h_pad[:B_real][None]     # [1, B, H], sorted order (matches PyTorch)
    return outputs, hiddens


# --------------------------- pure-JAX reference -------------------------------
def reference_forward(inputs_list, params):
    H = params["W_hh"].shape[1]
    lens = jnp.array([int(x.shape[0]) for x in inputs_list], dtype=jnp.int32)
    B = len(inputs_list)
    T = int(max(int(x.shape[0]) for x in inputs_list))
    fwd = jnp.argsort(-lens)
    back = jnp.argsort(fwd)
    pad = np.zeros((B, T), dtype=np.int32)
    for i, s in enumerate(inputs_list):
        pad[i, : s.shape[0]] = np.asarray(s)
    seq = jnp.asarray(pad)[fwd]
    sorted_len = lens[fwd]
    emb = params["embedding"][seq]
    W_ih, W_hh, b_ih, b_hh = (params["W_ih"], params["W_hh"],
                              params["b_ih"], params["b_hh"])
    h = jnp.zeros((B, H), jnp.float32)
    for t in range(T):
        x = emb[:, t]
        r = jax.nn.sigmoid(x @ W_ih[:H].T + b_ih[:H] + h @ W_hh[:H].T + b_hh[:H])
        z = jax.nn.sigmoid(x @ W_ih[H:2 * H].T + b_ih[H:2 * H]
                           + h @ W_hh[H:2 * H].T + b_hh[H:2 * H])
        n = jnp.tanh(x @ W_ih[2 * H:].T + b_ih[2 * H:]
                     + r * (h @ W_hh[2 * H:].T + b_hh[2 * H:]))
        h_new = (1.0 - z) * n + z * h
        h = jnp.where((t < sorted_len)[:, None], h_new, h)
    out = h @ params["W_out"].T + params["b_out"]
    return out[back], h[None]


# ------------------------------ param init ------------------------------------
def init_params(key, word_size, E, H, O):
    ks = jax.random.split(key, 8)
    emb = jax.random.normal(ks[0], (word_size, E), jnp.float32)
    emb = emb.at[0].set(0.0)                      # padding_idx = 0
    kg = 1.0 / np.sqrt(H)
    uni = lambda k, shape: jax.random.uniform(k, shape, jnp.float32, -kg, kg)
    return dict(
        embedding=emb,
        W_ih=uni(ks[1], (3 * H, E)),
        W_hh=uni(ks[2], (3 * H, H)),
        b_ih=uni(ks[3], (3 * H,)),
        b_hh=uni(ks[4], (3 * H,)),
        W_out=uni(ks[5], (O, H)),
        b_out=uni(ks[6], (O,)),
    )


if __name__ == "__main__":
    key = jax.random.PRNGKey(0)
    WORD, E, H, O = 50, 32, 32, 16          # word_size, em_size, hidden, output
    lengths = [5, 8, 3, 6]                  # batch of 4 variable-length sentences
    keys = jax.random.split(key, len(lengths) + 1)
    inputs = [jax.random.randint(keys[i], (L,), 1, WORD, dtype=jnp.int32)
              for i, L in enumerate(lengths)]
    params = init_params(keys[-1], WORD, E, H, O)

    outputs, hiddens = sentence_encoder_forward(inputs, params)
    jax.block_until_ready((outputs, hiddens))

    ref_out, ref_h = reference_forward(inputs, params)
    # tolerance accounts for bf16 MXU inputs (f32 accumulation everywhere)
    np.testing.assert_allclose(np.asarray(outputs), np.asarray(ref_out),
                               atol=3e-2, rtol=3e-2)
    np.testing.assert_allclose(np.asarray(hiddens), np.asarray(ref_h),
                               atol=3e-2, rtol=3e-2)
    print("KERNEL_OK")
</pallas_src>

<mosaic_0001>
module attributes {stable_mosaic.version = 11 : i64} {
  func.func @_gru_kernel(%arg0: memref<8x1xi32, #tpu.memory_space<vmem>>, %arg1: memref<64x32xbf16, #tpu.memory_space<vmem>>, %arg2: memref<32x96xbf16, #tpu.memory_space<vmem>>, %arg3: memref<1x96xf32, #tpu.memory_space<vmem>>, %arg4: memref<32x96xbf16, #tpu.memory_space<vmem>>, %arg5: memref<1x32xf32, #tpu.memory_space<vmem>>, %arg6: memref<32x16xbf16, #tpu.memory_space<vmem>>, %arg7: memref<1x16xf32, #tpu.memory_space<vmem>>, %arg8: memref<8x16xf32, #tpu.memory_space<vmem>>, %arg9: memref<8x32xf32, #tpu.memory_space<vmem>>, %arg10: memref<64x96xf32, #tpu.memory_space<vmem>>) attributes {dimension_semantics = [], scalar_prefetch = 0 : i64, scratch_operands = 1 : i64, tpu.core_type = #tpu.core_type<tc>} {
    %c0 = arith.constant 0 : index
    %c0_0 = arith.constant 0 : index
    %0 = vector.load %arg1[%c0, %c0_0] : memref<64x32xbf16, #tpu.memory_space<vmem>>, vector<64x32xbf16>
    %c0_1 = arith.constant 0 : index
    %c0_2 = arith.constant 0 : index
    %1 = vector.load %arg2[%c0_1, %c0_2] : memref<32x96xbf16, #tpu.memory_space<vmem>>, vector<32x96xbf16>
    %cst = arith.constant dense<0.000000e+00> : vector<64x96xf32>
    %2 = tpu.matmul %0, %1, %cst {dimension_numbers = #tpu.dot_dimension_numbers<[1], [0], [0], [1], [0, 0, 1, 1], [], []>} : vector<64x32xbf16>, vector<32x96xbf16>, vector<64x96xf32> -> vector<64x96xf32>
    %c0_3 = arith.constant 0 : index
    %c0_4 = arith.constant 0 : index
    %3 = vector.load %arg3[%c0_3, %c0_4] : memref<1x96xf32, #tpu.memory_space<vmem>>, vector<1x96xf32>
    %4 = vector.broadcast %3 : vector<1x96xf32> to vector<64x96xf32>
    %5 = arith.addf %2, %4 : vector<64x96xf32>
    %c0_5 = arith.constant 0 : index
    %c0_6 = arith.constant 0 : index
    %6 = vector.load %arg10[%c0_5, %c0_6] : memref<64x96xf32, #tpu.memory_space<vmem>>, vector<64x96xf32>
    tpu.vector_store %arg10[%c0_5, %c0_6], %5 {strides = array<i32>} : memref<64x96xf32, #tpu.memory_space<vmem>>, vector<64x96xf32>,
    %c0_7 = arith.constant 0 : index
    %c0_8 = arith.constant 0 : index
    %7 = vector.load %arg0[%c0_7, %c0_8] : memref<8x1xi32, #tpu.memory_space<vmem>>, vector<8x1xi32>
    %c0_9 = arith.constant 0 : index
    %c0_10 = arith.constant 0 : index
    %8 = vector.load %arg4[%c0_9, %c0_10] : memref<32x96xbf16, #tpu.memory_space<vmem>>, vector<32x96xbf16>
    %c0_11 = arith.constant 0 : index
    %c0_12 = arith.constant 0 : index
    %9 = vector.load %arg5[%c0_11, %c0_12] : memref<1x32xf32, #tpu.memory_space<vmem>>, vector<1x32xf32>
    %cst_13 = arith.constant 0.000000e+00 : f32
    %10 = vector.broadcast %cst_13 : f32 to vector<8x32xf32>
    %c0_i32 = arith.constant 0 : i32
    %c8_i32 = arith.constant 8 : i32
    %11 = arith.muli %c0_i32, %c8_i32 : i32
    %12 = tpu.assume_multiple %11, 8 : i32
    %13 = arith.index_cast %12 : i32 to index
    %c0_14 = arith.constant 0 : index
    %14 = vector.load %arg10[%13, %c0_14] : memref<64x96xf32, #tpu.memory_space<vmem>>, vector<8x96xf32>
    %15 = arith.truncf %10 : vector<8x32xf32> to vector<8x32xbf16>
    %cst_15 = arith.constant dense<0.000000e+00> : vector<8x96xf32>
    %16 = tpu.matmul %15, %8, %cst_15 {dimension_numbers = #tpu.dot_dimension_numbers<[1], [0], [0], [1], [0, 0, 1, 1], [], []>} : vector<8x32xbf16>, vector<32x96xbf16>, vector<8x96xf32> -> vector<8x96xf32>
    %17 = vector.extract_strided_slice %14 {offsets = [0, 0], sizes = [8, 32], strides = [1, 1]} : vector<8x96xf32> to vector<8x32xf32>
    %18 = vector.extract_strided_slice %16 {offsets = [0, 0], sizes = [8, 32], strides = [1, 1]} : vector<8x96xf32> to vector<8x32xf32>
    %19 = arith.addf %17, %18 : vector<8x32xf32>
    %20 = arith.negf %19 : vector<8x32xf32>
    %21 = math.exp %20 : vector<8x32xf32>
    %cst_16 = arith.constant 1.000000e+00 : f32
    %22 = vector.broadcast %cst_16 : f32 to vector<8x32xf32>
    %23 = arith.addf %22, %21 : vector<8x32xf32>
    %24 = arith.divf %22, %23 : vector<8x32xf32>
    %25 = vector.extract_strided_slice %14 {offsets = [0, 32], sizes = [8, 32], strides = [1, 1]} : vector<8x96xf32> to vector<8x32xf32>
    %26 = vector.extract_strided_slice %16 {offsets = [0, 32], sizes = [8, 32], strides = [1, 1]} : vector<8x96xf32> to vector<8x32xf32>
    %27 = arith.addf %25, %26 : vector<8x32xf32>
    %28 = arith.negf %27 : vector<8x32xf32>
    %29 = math.exp %28 : vector<8x32xf32>
    %cst_17 = arith.constant 1.000000e+00 : f32
    %30 = vector.broadcast %cst_17 : f32 to vector<8x32xf32>
    %31 = arith.addf %30, %29 : vector<8x32xf32>
    %32 = arith.divf %30, %31 : vector<8x32xf32>
    %33 = vector.extract_strided_slice %14 {offsets = [0, 64], sizes = [8, 32], strides = [1, 1]} : vector<8x96xf32> to vector<8x32xf32>
    %34 = vector.extract_strided_slice %16 {offsets = [0, 64], sizes = [8, 32], strides = [1, 1]} : vector<8x96xf32> to vector<8x32xf32>
    %35 = vector.broadcast %9 : vector<1x32xf32> to vector<8x32xf32>
    %36 = arith.addf %34, %35 : vector<8x32xf32>
    %37 = arith.mulf %24, %36 : vector<8x32xf32>
    %38 = arith.addf %33, %37 : vector<8x32xf32>
    %39 = math.tanh %38 : vector<8x32xf32>
    %cst_18 = arith.constant 1.000000e+00 : f32
    %40 = vector.broadcast %cst_18 : f32 to vector<8x32xf32>
    %41 = arith.subf %40, %32 : vector<8x32xf32>
    %42 = arith.mulf %41, %39 : vector<8x32xf32>
    %43 = arith.mulf %32, %10 : vector<8x32xf32>
    %44 = arith.addf %42, %43 : vector<8x32xf32>
    %45 = vector.broadcast %c0_i32 : i32 to vector<8x1xi32>
    %46 = arith.cmpi slt, %45, %7 : vector<8x1xi32>
    %47 = vector.shape_cast %46 : vector<8x1xi1> to vector<8x1xi1>
    %48 = vector.broadcast %47 : vector<8x1xi1> to vector<8x32xi1>
    %49 = arith.select %48, %44, %10 : vector<8x32xi1>, vector<8x32xf32>
    %c1_i32 = arith.constant 1 : i32
    %c8_i32_19 = arith.constant 8 : i32
    %50 = arith.muli %c1_i32, %c8_i32_19 : i32
    %51 = tpu.assume_multiple %50, 8 : i32
    %52 = arith.index_cast %51 : i32 to index
    %c0_20 = arith.constant 0 : index
    %53 = vector.load %arg10[%52, %c0_20] : memref<64x96xf32, #tpu.memory_space<vmem>>, vector<8x96xf32>
    %54 = arith.truncf %49 : vector<8x32xf32> to vector<8x32xbf16>
    %cst_21 = arith.constant dense<0.000000e+00> : vector<8x96xf32>
    %55 = tpu.matmul %54, %8, %cst_21 {dimension_numbers = #tpu.dot_dimension_numbers<[1], [0], [0], [1], [0, 0, 1, 1], [], []>} : vector<8x32xbf16>, vector<32x96xbf16>, vector<8x96xf32> -> vector<8x96xf32>
    %56 = vector.extract_strided_slice %53 {offsets = [0, 0], sizes = [8, 32], strides = [1, 1]} : vector<8x96xf32> to vector<8x32xf32>
    %57 = vector.extract_strided_slice %55 {offsets = [0, 0], sizes = [8, 32], strides = [1, 1]} : vector<8x96xf32> to vector<8x32xf32>
    %58 = arith.addf %56, %57 : vector<8x32xf32>
    %59 = arith.negf %58 : vector<8x32xf32>
    %60 = math.exp %59 : vector<8x32xf32>
    %cst_22 = arith.constant 1.000000e+00 : f32
    %61 = vector.broadcast %cst_22 : f32 to vector<8x32xf32>
    %62 = arith.addf %61, %60 : vector<8x32xf32>
    %63 = arith.divf %61, %62 : vector<8x32xf32>
    %64 = vector.extract_strided_slice %53 {offsets = [0, 32], sizes = [8, 32], strides = [1, 1]} : vector<8x96xf32> to vector<8x32xf32>
    %65 = vector.extract_strided_slice %55 {offsets = [0, 32], sizes = [8, 32], strides = [1, 1]} : vector<8x96xf32> to vector<8x32xf32>
    %66 = arith.addf %64, %65 : vector<8x32xf32>
    %67 = arith.negf %66 : vector<8x32xf32>
    %68 = math.exp %67 : vector<8x32xf32>
    %cst_23 = arith.constant 1.000000e+00 : f32
    %69 = vector.broadcast %cst_23 : f32 to vector<8x32xf32>
    %70 = arith.addf %69, %68 : vector<8x32xf32>
    %71 = arith.divf %69, %70 : vector<8x32xf32>
    %72 = vector.extract_strided_slice %53 {offsets = [0, 64], sizes = [8, 32], strides = [1, 1]} : vector<8x96xf32> to vector<8x32xf32>
    %73 = vector.extract_strided_slice %55 {offsets = [0, 64], sizes = [8, 32], strides = [1, 1]} : vector<8x96xf32> to vector<8x32xf32>
    %74 = vector.broadcast %9 : vector<1x32xf32> to vector<8x32xf32>
    %75 = arith.addf %73, %74 : vector<8x32xf32>
    %76 = arith.mulf %63, %75 : vector<8x32xf32>
    %77 = arith.addf %72, %76 : vector<8x32xf32>
    %78 = math.tanh %77 : vector<8x32xf32>
    %cst_24 = arith.constant 1.000000e+00 : f32
    %79 = vector.broadcast %cst_24 : f32 to vector<8x32xf32>
    %80 = arith.subf %79, %71 : vector<8x32xf32>
    %81 = arith.mulf %80, %78 : vector<8x32xf32>
    %82 = arith.mulf %71, %49 : vector<8x32xf32>
    %83 = arith.addf %81, %82 : vector<8x32xf32>
    %84 = vector.broadcast %c1_i32 : i32 to vector<8x1xi32>
    %85 = arith.cmpi slt, %84, %7 : vector<8x1xi32>
    %86 = vector.shape_cast %85 : vector<8x1xi1> to vector<8x1xi1>
    %87 = vector.broadcast %86 : vector<8x1xi1> to vector<8x32xi1>
    %88 = arith.select %87, %83, %49 : vector<8x32xi1>, vector<8x32xf32>
    %c2_i32 = arith.constant 2 : i32
    %c8_i32_25 = arith.constant 8 : i32
    %89 = arith.muli %c2_i32, %c8_i32_25 : i32
    %90 = tpu.assume_multiple %89, 8 : i32
    %91 = arith.index_cast %90 : i32 to index
    %c0_26 = arith.constant 0 : index
    %92 = vector.load %arg10[%91, %c0_26] : memref<64x96xf32, #tpu.memory_space<vmem>>, vector<8x96xf32>
    %93 = arith.truncf %88 : vector<8x32xf32> to vector<8x32xbf16>
    %cst_27 = arith.constant dense<0.000000e+00> : vector<8x96xf32>
    %94 = tpu.matmul %93, %8, %cst_27 {dimension_numbers = #tpu.dot_dimension_numbers<[1], [0], [0], [1], [0, 0, 1, 1], [], []>} : vector<8x32xbf16>, vector<32x96xbf16>, vector<8x96xf32> -> vector<8x96xf32>
    %95 = vector.extract_strided_slice %92 {offsets = [0, 0], sizes = [8, 32], strides = [1, 1]} : vector<8x96xf32> to vector<8x32xf32>
    %96 = vector.extract_strided_slice %94 {offsets = [0, 0], sizes = [8, 32], strides = [1, 1]} : vector<8x96xf32> to vector<8x32xf32>
    %97 = arith.addf %95, %96 : vector<8x32xf32>
    %98 = arith.negf %97 : vector<8x32xf32>
    %99 = math.exp %98 : vector<8x32xf32>
    %cst_28 = arith.constant 1.000000e+00 : f32
    %100 = vector.broadcast %cst_28 : f32 to vector<8x32xf32>
    %101 = arith.addf %100, %99 : vector<8x32xf32>
    %102 = arith.divf %100, %101 : vector<8x32xf32>
    %103 = vector.extract_strided_slice %92 {offsets = [0, 32], sizes = [8, 32], strides = [1, 1]} : vector<8x96xf32> to vector<8x32xf32>
    %104 = vector.extract_strided_slice %94 {offsets = [0, 32], sizes = [8, 32], strides = [1, 1]} : vector<8x96xf32> to vector<8x32xf32>
    %105 = arith.addf %103, %104 : vector<8x32xf32>
    %106 = arith.negf %105 : vector<8x32xf32>
    %107 = math.exp %106 : vector<8x32xf32>
    %cst_29 = arith.constant 1.000000e+00 : f32
    %108 = vector.broadcast %cst_29 : f32 to vector<8x32xf32>
    %109 = arith.addf %108, %107 : vector<8x32xf32>
    %110 = arith.divf %108, %109 : vector<8x32xf32>
    %111 = vector.extract_strided_slice %92 {offsets = [0, 64], sizes = [8, 32], strides = [1, 1]} : vector<8x96xf32> to vector<8x32xf32>
    %112 = vector.extract_strided_slice %94 {offsets = [0, 64], sizes = [8, 32], strides = [1, 1]} : vector<8x96xf32> to vector<8x32xf32>
    %113 = vector.broadcast %9 : vector<1x32xf32> to vector<8x32xf32>
    %114 = arith.addf %112, %113 : vector<8x32xf32>
    %115 = arith.mulf %102, %114 : vector<8x32xf32>
    %116 = arith.addf %111, %115 : vector<8x32xf32>
    %117 = math.tanh %116 : vector<8x32xf32>
    %cst_30 = arith.constant 1.000000e+00 : f32
    %118 = vector.broadcast %cst_30 : f32 to vector<8x32xf32>
    %119 = arith.subf %118, %110 : vector<8x32xf32>
    %120 = arith.mulf %119, %117 : vector<8x32xf32>
    %121 = arith.mulf %110, %88 : vector<8x32xf32>
    %122 = arith.addf %120, %121 : vector<8x32xf32>
    %123 = vector.broadcast %c2_i32 : i32 to vector<8x1xi32>
    %124 = arith.cmpi slt, %123, %7 : vector<8x1xi32>
    %125 = vector.shape_cast %124 : vector<8x1xi1> to vector<8x1xi1>
    %126 = vector.broadcast %125 : vector<8x1xi1> to vector<8x32xi1>
    %127 = arith.select %126, %122, %88 : vector<8x32xi1>, vector<8x32xf32>
    %c3_i32 = arith.constant 3 : i32
    %c8_i32_31 = arith.constant 8 : i32
    %128 = arith.muli %c3_i32, %c8_i32_31 : i32
    %129 = tpu.assume_multiple %128, 8 : i32
    %130 = arith.index_cast %129 : i32 to index
    %c0_32 = arith.constant 0 : index
    %131 = vector.load %arg10[%130, %c0_32] : memref<64x96xf32, #tpu.memory_space<vmem>>, vector<8x96xf32>
    %132 = arith.truncf %127 : vector<8x32xf32> to vector<8x32xbf16>
    %cst_33 = arith.constant dense<0.000000e+00> : vector<8x96xf32>
    %133 = tpu.matmul %132, %8, %cst_33 {dimension_numbers = #tpu.dot_dimension_numbers<[1], [0], [0], [1], [0, 0, 1, 1], [], []>} : vector<8x32xbf16>, vector<32x96xbf16>, vector<8x96xf32> -> vector<8x96xf32>
    %134 = vector.extract_strided_slice %131 {offsets = [0, 0], sizes = [8, 32], strides = [1, 1]} : vector<8x96xf32> to vector<8x32xf32>
    %135 = vector.extract_strided_slice %133 {offsets = [0, 0], sizes = [8, 32], strides = [1, 1]} : vector<8x96xf32> to vector<8x32xf32>
    %136 = arith.addf %134, %135 : vector<8x32xf32>
    %137 = arith.negf %136 : vector<8x32xf32>
    %138 = math.exp %137 : vector<8x32xf32>
    %cst_34 = arith.constant 1.000000e+00 : f32
    %139 = vector.broadcast %cst_34 : f32 to vector<8x32xf32>
    %140 = arith.addf %139, %138 : vector<8x32xf32>
    %141 = arith.divf %139, %140 : vector<8x32xf32>
    %142 = vector.extract_strided_slice %131 {offsets = [0, 32], sizes = [8, 32], strides = [1, 1]} : vector<8x96xf32> to vector<8x32xf32>
    %143 = vector.extract_strided_slice %133 {offsets = [0, 32], sizes = [8, 32], strides = [1, 1]} : vector<8x96xf32> to vector<8x32xf32>
    %144 = arith.addf %142, %143 : vector<8x32xf32>
    %145 = arith.negf %144 : vector<8x32xf32>
    %146 = math.exp %145 : vector<8x32xf32>
    %cst_35 = arith.constant 1.000000e+00 : f32
    %147 = vector.broadcast %cst_35 : f32 to vector<8x32xf32>
    %148 = arith.addf %147, %146 : vector<8x32xf32>
    %149 = arith.divf %147, %148 : vector<8x32xf32>
    %150 = vector.extract_strided_slice %131 {offsets = [0, 64], sizes = [8, 32], strides = [1, 1]} : vector<8x96xf32> to vector<8x32xf32>
    %151 = vector.extract_strided_slice %133 {offsets = [0, 64], sizes = [8, 32], strides = [1, 1]} : vector<8x96xf32> to vector<8x32xf32>
    %152 = vector.broadcast %9 : vector<1x32xf32> to vector<8x32xf32>
    %153 = arith.addf %151, %152 : vector<8x32xf32>
    %154 = arith.mulf %141, %153 : vector<8x32xf32>
    %155 = arith.addf %150, %154 : vector<8x32xf32>
    %156 = math.tanh %155 : vector<8x32xf32>
    %cst_36 = arith.constant 1.000000e+00 : f32
    %157 = vector.broadcast %cst_36 : f32 to vector<8x32xf32>
    %158 = arith.subf %157, %149 : vector<8x32xf32>
    %159 = arith.mulf %158, %156 : vector<8x32xf32>
    %160 = arith.mulf %149, %127 : vector<8x32xf32>
    %161 = arith.addf %159, %160 : vector<8x32xf32>
    %162 = vector.broadcast %c3_i32 : i32 to vector<8x1xi32>
    %163 = arith.cmpi slt, %162, %7 : vector<8x1xi32>
    %164 = vector.shape_cast %163 : vector<8x1xi1> to vector<8x1xi1>
    %165 = vector.broadcast %164 : vector<8x1xi1> to vector<8x32xi1>
    %166 = arith.select %165, %161, %127 : vector<8x32xi1>, vector<8x32xf32>
    %c4_i32 = arith.constant 4 : i32
    %c8_i32_37 = arith.constant 8 : i32
    %167 = arith.muli %c4_i32, %c8_i32_37 : i32
    %168 = tpu.assume_multiple %167, 8 : i32
    %169 = arith.index_cast %168 : i32 to index
    %c0_38 = arith.constant 0 : index
    %170 = vector.load %arg10[%169, %c0_38] : memref<64x96xf32, #tpu.memory_space<vmem>>, vector<8x96xf32>
    %171 = arith.truncf %166 : vector<8x32xf32> to vector<8x32xbf16>
    %cst_39 = arith.constant dense<0.000000e+00> : vector<8x96xf32>
    %172 = tpu.matmul %171, %8, %cst_39 {dimension_numbers = #tpu.dot_dimension_numbers<[1], [0], [0], [1], [0, 0, 1, 1], [], []>} : vector<8x32xbf16>, vector<32x96xbf16>, vector<8x96xf32> -> vector<8x96xf32>
    %173 = vector.extract_strided_slice %170 {offsets = [0, 0], sizes = [8, 32], strides = [1, 1]} : vector<8x96xf32> to vector<8x32xf32>
    %174 = vector.extract_strided_slice %172 {offsets = [0, 0], sizes = [8, 32], strides = [1, 1]} : vector<8x96xf32> to vector<8x32xf32>
    %175 = arith.addf %173, %174 : vector<8x32xf32>
    %176 = arith.negf %175 : vector<8x32xf32>
    %177 = math.exp %176 : vector<8x32xf32>
    %cst_40 = arith.constant 1.000000e+00 : f32
    %178 = vector.broadcast %cst_40 : f32 to vector<8x32xf32>
    %179 = arith.addf %178, %177 : vector<8x32xf32>
    %180 = arith.divf %178, %179 : vector<8x32xf32>
    %181 = vector.extract_strided_slice %170 {offsets = [0, 32], sizes = [8, 32], strides = [1, 1]} : vector<8x96xf32> to vector<8x32xf32>
    %182 = vector.extract_strided_slice %172 {offsets = [0, 32], sizes = [8, 32], strides = [1, 1]} : vector<8x96xf32> to vector<8x32xf32>
    %183 = arith.addf %181, %182 : vector<8x32xf32>
    %184 = arith.negf %183 : vector<8x32xf32>
    %185 = math.exp %184 : vector<8x32xf32>
    %cst_41 = arith.constant 1.000000e+00 : f32
    %186 = vector.broadcast %cst_41 : f32 to vector<8x32xf32>
    %187 = arith.addf %186, %185 : vector<8x32xf32>
    %188 = arith.divf %186, %187 : vector<8x32xf32>
    %189 = vector.extract_strided_slice %170 {offsets = [0, 64], sizes = [8, 32], strides = [1, 1]} : vector<8x96xf32> to vector<8x32xf32>
    %190 = vector.extract_strided_slice %172 {offsets = [0, 64], sizes = [8, 32], strides = [1, 1]} : vector<8x96xf32> to vector<8x32xf32>
    %191 = vector.broadcast %9 : vector<1x32xf32> to vector<8x32xf32>
    %192 = arith.addf %190, %191 : vector<8x32xf32>
    %193 = arith.mulf %180, %192 : vector<8x32xf32>
    %194 = arith.addf %189, %193 : vector<8x32xf32>
    %195 = math.tanh %194 : vector<8x32xf32>
    %cst_42 = arith.constant 1.000000e+00 : f32
    %196 = vector.broadcast %cst_42 : f32 to vector<8x32xf32>
    %197 = arith.subf %196, %188 : vector<8x32xf32>
    %198 = arith.mulf %197, %195 : vector<8x32xf32>
    %199 = arith.mulf %188, %166 : vector<8x32xf32>
    %200 = arith.addf %198, %199 : vector<8x32xf32>
    %201 = vector.broadcast %c4_i32 : i32 to vector<8x1xi32>
    %202 = arith.cmpi slt, %201, %7 : vector<8x1xi32>
    %203 = vector.shape_cast %202 : vector<8x1xi1> to vector<8x1xi1>
    %204 = vector.broadcast %203 : vector<8x1xi1> to vector<8x32xi1>
    %205 = arith.select %204, %200, %166 : vector<8x32xi1>, vector<8x32xf32>
    %c5_i32 = arith.constant 5 : i32
    %c8_i32_43 = arith.constant 8 : i32
    %206 = arith.muli %c5_i32, %c8_i32_43 : i32
    %207 = tpu.assume_multiple %206, 8 : i32
    %208 = arith.index_cast %207 : i32 to index
    %c0_44 = arith.constant 0 : index
    %209 = vector.load %arg10[%208, %c0_44] : memref<64x96xf32, #tpu.memory_space<vmem>>, vector<8x96xf32>
    %210 = arith.truncf %205 : vector<8x32xf32> to vector<8x32xbf16>
    %cst_45 = arith.constant dense<0.000000e+00> : vector<8x96xf32>
    %211 = tpu.matmul %210, %8, %cst_45 {dimension_numbers = #tpu.dot_dimension_numbers<[1], [0], [0], [1], [0, 0, 1, 1], [], []>} : vector<8x32xbf16>, vector<32x96xbf16>, vector<8x96xf32> -> vector<8x96xf32>
    %212 = vector.extract_strided_slice %209 {offsets = [0, 0], sizes = [8, 32], strides = [1, 1]} : vector<8x96xf32> to vector<8x32xf32>
    %213 = vector.extract_strided_slice %211 {offsets = [0, 0], sizes = [8, 32], strides = [1, 1]} : vector<8x96xf32> to vector<8x32xf32>
    %214 = arith.addf %212, %213 : vector<8x32xf32>
    %215 = arith.negf %214 : vector<8x32xf32>
    %216 = math.exp %215 : vector<8x32xf32>
    %cst_46 = arith.constant 1.000000e+00 : f32
    %217 = vector.broadcast %cst_46 : f32 to vector<8x32xf32>
    %218 = arith.addf %217, %216 : vector<8x32xf32>
    %219 = arith.divf %217, %218 : vector<8x32xf32>
    %220 = vector.extract_strided_slice %209 {offsets = [0, 32], sizes = [8, 32], strides = [1, 1]} : vector<8x96xf32> to vector<8x32xf32>
    %221 = vector.extract_strided_slice %211 {offsets = [0, 32], sizes = [8, 32], strides = [1, 1]} : vector<8x96xf32> to vector<8x32xf32>
    %222 = arith.addf %220, %221 : vector<8x32xf32>
    %223 = arith.negf %222 : vector<8x32xf32>
    %224 = math.exp %223 : vector<8x32xf32>
    %cst_47 = arith.constant 1.000000e+00 : f32
    %225 = vector.broadcast %cst_47 : f32 to vector<8x32xf32>
    %226 = arith.addf %225, %224 : vector<8x32xf32>
    %227 = arith.divf %225, %226 : vector<8x32xf32>
    %228 = vector.extract_strided_slice %209 {offsets = [0, 64], sizes = [8, 32], strides = [1, 1]} : vector<8x96xf32> to vector<8x32xf32>
    %229 = vector.extract_strided_slice %211 {offsets = [0, 64], sizes = [8, 32], strides = [1, 1]} : vector<8x96xf32> to vector<8x32xf32>
    %230 = vector.broadcast %9 : vector<1x32xf32> to vector<8x32xf32>
    %231 = arith.addf %229, %230 : vector<8x32xf32>
    %232 = arith.mulf %219, %231 : vector<8x32xf32>
    %233 = arith.addf %228, %232 : vector<8x32xf32>
    %234 = math.tanh %233 : vector<8x32xf32>
    %cst_48 = arith.constant 1.000000e+00 : f32
    %235 = vector.broadcast %cst_48 : f32 to vector<8x32xf32>
    %236 = arith.subf %235, %227 : vector<8x32xf32>
    %237 = arith.mulf %236, %234 : vector<8x32xf32>
    %238 = arith.mulf %227, %205 : vector<8x32xf32>
    %239 = arith.addf %237, %238 : vector<8x32xf32>
    %240 = vector.broadcast %c5_i32 : i32 to vector<8x1xi32>
    %241 = arith.cmpi slt, %240, %7 : vector<8x1xi32>
    %242 = vector.shape_cast %241 : vector<8x1xi1> to vector<8x1xi1>
    %243 = vector.broadcast %242 : vector<8x1xi1> to vector<8x32xi1>
    %244 = arith.select %243, %239, %205 : vector<8x32xi1>, vector<8x32xf32>
    %c6_i32 = arith.constant 6 : i32
    %c8_i32_49 = arith.constant 8 : i32
    %245 = arith.muli %c6_i32, %c8_i32_49 : i32
    %246 = tpu.assume_multiple %245, 8 : i32
    %247 = arith.index_cast %246 : i32 to index
    %c0_50 = arith.constant 0 : index
    %248 = vector.load %arg10[%247, %c0_50] : memref<64x96xf32, #tpu.memory_space<vmem>>, vector<8x96xf32>
    %249 = arith.truncf %244 : vector<8x32xf32> to vector<8x32xbf16>
    %cst_51 = arith.constant dense<0.000000e+00> : vector<8x96xf32>
    %250 = tpu.matmul %249, %8, %cst_51 {dimension_numbers = #tpu.dot_dimension_numbers<[1], [0], [0], [1], [0, 0, 1, 1], [], []>} : vector<8x32xbf16>, vector<32x96xbf16>, vector<8x96xf32> -> vector<8x96xf32>
    %251 = vector.extract_strided_slice %248 {offsets = [0, 0], sizes = [8, 32], strides = [1, 1]} : vector<8x96xf32> to vector<8x32xf32>
    %252 = vector.extract_strided_slice %250 {offsets = [0, 0], sizes = [8, 32], strides = [1, 1]} : vector<8x96xf32> to vector<8x32xf32>
    %253 = arith.addf %251, %252 : vector<8x32xf32>
    %254 = arith.negf %253 : vector<8x32xf32>
    %255 = math.exp %254 : vector<8x32xf32>
    %cst_52 = arith.constant 1.000000e+00 : f32
    %256 = vector.broadcast %cst_52 : f32 to vector<8x32xf32>
    %257 = arith.addf %256, %255 : vector<8x32xf32>
    %258 = arith.divf %256, %257 : vector<8x32xf32>
    %259 = vector.extract_strided_slice %248 {offsets = [0, 32], sizes = [8, 32], strides = [1, 1]} : vector<8x96xf32> to vector<8x32xf32>
    %260 = vector.extract_strided_slice %250 {offsets = [0, 32], sizes = [8, 32], strides = [1, 1]} : vector<8x96xf32> to vector<8x32xf32>
    %261 = arith.addf %259, %260 : vector<8x32xf32>
    %262 = arith.negf %261 : vector<8x32xf32>
    %263 = math.exp %262 : vector<8x32xf32>
    %cst_53 = arith.constant 1.000000e+00 : f32
    %264 = vector.broadcast %cst_53 : f32 to vector<8x32xf32>
    %265 = arith.addf %264, %263 : vector<8x32xf32>
    %266 = arith.divf %264, %265 : vector<8x32xf32>
    %267 = vector.extract_strided_slice %248 {offsets = [0, 64], sizes = [8, 32], strides = [1, 1]} : vector<8x96xf32> to vector<8x32xf32>
    %268 = vector.extract_strided_slice %250 {offsets = [0, 64], sizes = [8, 32], strides = [1, 1]} : vector<8x96xf32> to vector<8x32xf32>
    %269 = vector.broadcast %9 : vector<1x32xf32> to vector<8x32xf32>
    %270 = arith.addf %268, %269 : vector<8x32xf32>
    %271 = arith.mulf %258, %270 : vector<8x32xf32>
    %272 = arith.addf %267, %271 : vector<8x32xf32>
    %273 = math.tanh %272 : vector<8x32xf32>
    %cst_54 = arith.constant 1.000000e+00 : f32
    %274 = vector.broadcast %cst_54 : f32 to vector<8x32xf32>
    %275 = arith.subf %274, %266 : vector<8x32xf32>
    %276 = arith.mulf %275, %273 : vector<8x32xf32>
    %277 = arith.mulf %266, %244 : vector<8x32xf32>
    %278 = arith.addf %276, %277 : vector<8x32xf32>
    %279 = vector.broadcast %c6_i32 : i32 to vector<8x1xi32>
    %280 = arith.cmpi slt, %279, %7 : vector<8x1xi32>
    %281 = vector.shape_cast %280 : vector<8x1xi1> to vector<8x1xi1>
    %282 = vector.broadcast %281 : vector<8x1xi1> to vector<8x32xi1>
    %283 = arith.select %282, %278, %244 : vector<8x32xi1>, vector<8x32xf32>
    %c7_i32 = arith.constant 7 : i32
    %c8_i32_55 = arith.constant 8 : i32
    %284 = arith.muli %c7_i32, %c8_i32_55 : i32
    %285 = tpu.assume_multiple %284, 8 : i32
    %286 = arith.index_cast %285 : i32 to index
    %c0_56 = arith.constant 0 : index
    %287 = vector.load %arg10[%286, %c0_56] : memref<64x96xf32, #tpu.memory_space<vmem>>, vector<8x96xf32>
    %288 = arith.truncf %283 : vector<8x32xf32> to vector<8x32xbf16>
    %cst_57 = arith.constant dense<0.000000e+00> : vector<8x96xf32>
    %289 = tpu.matmul %288, %8, %cst_57 {dimension_numbers = #tpu.dot_dimension_numbers<[1], [0], [0], [1], [0, 0, 1, 1], [], []>} : vector<8x32xbf16>, vector<32x96xbf16>, vector<8x96xf32> -> vector<8x96xf32>
    %290 = vector.extract_strided_slice %287 {offsets = [0, 0], sizes = [8, 32], strides = [1, 1]} : vector<8x96xf32> to vector<8x32xf32>
    %291 = vector.extract_strided_slice %289 {offsets = [0, 0], sizes = [8, 32], strides = [1, 1]} : vector<8x96xf32> to vector<8x32xf32>
    %292 = arith.addf %290, %291 : vector<8x32xf32>
    %293 = arith.negf %292 : vector<8x32xf32>
    %294 = math.exp %293 : vector<8x32xf32>
    %cst_58 = arith.constant 1.000000e+00 : f32
    %295 = vector.broadcast %cst_58 : f32 to vector<8x32xf32>
    %296 = arith.addf %295, %294 : vector<8x32xf32>
    %297 = arith.divf %295, %296 : vector<8x32xf32>
    %298 = vector.extract_strided_slice %287 {offsets = [0, 32], sizes = [8, 32], strides = [1, 1]} : vector<8x96xf32> to vector<8x32xf32>
    %299 = vector.extract_strided_slice %289 {offsets = [0, 32], sizes = [8, 32], strides = [1, 1]} : vector<8x96xf32> to vector<8x32xf32>
    %300 = arith.addf %298, %299 : vector<8x32xf32>
    %301 = arith.negf %300 : vector<8x32xf32>
    %302 = math.exp %301 : vector<8x32xf32>
    %cst_59 = arith.constant 1.000000e+00 : f32
    %303 = vector.broadcast %cst_59 : f32 to vector<8x32xf32>
    %304 = arith.addf %303, %302 : vector<8x32xf32>
    %305 = arith.divf %303, %304 : vector<8x32xf32>
    %306 = vector.extract_strided_slice %287 {offsets = [0, 64], sizes = [8, 32], strides = [1, 1]} : vector<8x96xf32> to vector<8x32xf32>
    %307 = vector.extract_strided_slice %289 {offsets = [0, 64], sizes = [8, 32], strides = [1, 1]} : vector<8x96xf32> to vector<8x32xf32>
    %308 = vector.broadcast %9 : vector<1x32xf32> to vector<8x32xf32>
    %309 = arith.addf %307, %308 : vector<8x32xf32>
    %310 = arith.mulf %297, %309 : vector<8x32xf32>
    %311 = arith.addf %306, %310 : vector<8x32xf32>
    %312 = math.tanh %311 : vector<8x32xf32>
    %cst_60 = arith.constant 1.000000e+00 : f32
    %313 = vector.broadcast %cst_60 : f32 to vector<8x32xf32>
    %314 = arith.subf %313, %305 : vector<8x32xf32>
    %315 = arith.mulf %314, %312 : vector<8x32xf32>
    %316 = arith.mulf %305, %283 : vector<8x32xf32>
    %317 = arith.addf %315, %316 : vector<8x32xf32>
    %318 = vector.broadcast %c7_i32 : i32 to vector<8x1xi32>
    %319 = arith.cmpi slt, %318, %7 : vector<8x1xi32>
    %320 = vector.shape_cast %319 : vector<8x1xi1> to vector<8x1xi1>
    %321 = vector.broadcast %320 : vector<8x1xi1> to vector<8x32xi1>
    %322 = arith.select %321, %317, %283 : vector<8x32xi1>, vector<8x32xf32>
    %c8_i32_61 = arith.constant 8 : i32
    %c0_62 = arith.constant 0 : index
    %c0_63 = arith.constant 0 : index
    %323 = vector.load %arg9[%c0_62, %c0_63] : memref<8x32xf32, #tpu.memory_space<vmem>>, vector<8x32xf32>
    tpu.vector_store %arg9[%c0_62, %c0_63], %322 {strides = array<i32>} : memref<8x32xf32, #tpu.memory_space<vmem>>, vector<8x32xf32>,
    %324 = arith.truncf %322 : vector<8x32xf32> to vector<8x32xbf16>
    %c0_64 = arith.constant 0 : index
    %c0_65 = arith.constant 0 : index
    %325 = vector.load %arg6[%c0_64, %c0_65] : memref<32x16xbf16, #tpu.memory_space<vmem>>, vector<32x16xbf16>
    %cst_66 = arith.constant dense<0.000000e+00> : vector<8x16xf32>
    %326 = tpu.matmul %324, %325, %cst_66 {dimension_numbers = #tpu.dot_dimension_numbers<[1], [0], [0], [1], [0, 0, 1, 1], [], []>} : vector<8x32xbf16>, vector<32x16xbf16>, vector<8x16xf32> -> vector<8x16xf32>
    %c0_67 = arith.constant 0 : index
    %c0_68 = arith.constant 0 : index
    %327 = vector.load %arg7[%c0_67, %c0_68] : memref<1x16xf32, #tpu.memory_space<vmem>>, vector<1x16xf32>
    %328 = vector.broadcast %327 : vector<1x16xf32> to vector<8x16xf32>
    %329 = arith.addf %326, %328 : vector<8x16xf32>
    %c0_69 = arith.constant 0 : index
    %c0_70 = arith.constant 0 : index
    %330 = vector.load %arg8[%c0_69, %c0_70] : memref<8x16xf32, #tpu.memory_space<vmem>>, vector<8x16xf32>
    tpu.vector_store %arg8[%c0_69, %c0_70], %329 {strides = array<i32>} : memref<8x16xf32, #tpu.memory_space<vmem>>, vector<8x16xf32>,
    return
  }
}

</mosaic_0001>

<bundles_post_ra>
// kernel: tpu_custom_call.1
= control target key start
LH: loop header
LB: loop body
LE: loop exit
PB: predicated region body
PF: predicated region fallthrough
CT: control target
= control target key end

     0   :  { %15 = vsyncpa [#allocation4], 0  ;;  %v963_v4 = vmov 0   ;;  %s1183_s0 = inlined_call_operand.vmem [shape: s32[8,1], index: 0, kind: input, shape index: {}]   ;;  %s1184_s1 = inlined_call_operand.vmem [shape: bf16[64,32], index: 1, kind: input, shape index: {}]   ;;  %s1185_s2 = inlined_call_operand.vmem [shape: bf16[32,96], index: 2, kind: input, shape index: {}]   ;;  %s1186_s3 = inlined_call_operand.vmem [shape: f32[1,96], index: 3, kind: input, shape index: {}]   ;;  %s1187_s4 = inlined_call_operand.vmem [shape: bf16[32,96], index: 4, kind: input, shape index: {}]   ;;  %s1188_s5 = inlined_call_operand.vmem [shape: f32[1,32], index: 5, kind: input, shape index: {}]   ;;  %s1189_s6 = inlined_call_operand.vmem [shape: bf16[32,16], index: 6, kind: input, shape index: {}]   ;;  %s1190_s7 = inlined_call_operand.vmem [shape: f32[1,16], index: 7, kind: input, shape index: {}]   ;;  %s1191_s8 = inlined_call_operand.hbm [shape: f32[8,16], index: 8, kind: output, shape index: {0}]   ;;  %s1192_s9 = inlined_call_operand.hbm [shape: f32[8,32], index: 9, kind: output, shape index: {1}]  }
   0x1   :  { %v847_v0 = vld [vmem:[%s1185_s2 + $0x8] sm:$0xff]  ;;  %v846_v2 = vld [vmem:[%s1185_s2] sm:$0xff]  ;;  %857 = vset.pattern.permute.xlu2 %v963_v4  ;;  %858 = vset.pattern.permute.xlu0 %v963_v4 }
   0x2   :  { %v1024_v1 = vld [vmem:[%s1187_s4 + $0x8] sm:$0xff]  ;;  %v1032_v3 = vld [vmem:[%s1187_s4] sm:$0xff]  ;;  %101 = vmatpush.bf16.msra.mxu0 %v847_v0 }
   0x3   :  { %161 = vmatpush.bf16.msra.mxu1 %v1024_v1  ;;  %v860_v5 = vld [vmem:[%s1188_s5] ss:$0 sm:$0xff]  ;;  %235 = vmatpush.bf16.msra.mxu2 %v1024_v1 }
   0x4   :  { %304 = vmatpush.bf16.msra.mxu3 %v1024_v1 }
   0x5   :  { %16 = vsyncpa [#allocation6], 0  ;;  %s964_s2 = smov 64   ;;  %859 = vset.pattern.permute.xlu1 %v963_v4  ;;  %v842_v6 = vld [vmem:[%s1184_s1] sm:$0xff]  ;;  %vm82_vm0 = vcmask 261120   ;;  %vm124_vm1 = vcmask 785408  }
   0x6   :  { %190 = vrot.lane.b32.xlu0 %v860_v5, %s964_s2  ;;  %102 = vmatpush.bf16.msra.mxu0 %v846_v2  ;;  %v1063_v7 = vld [vmem:[%s1186_s3] ss:$0 sm:$0xff]  ;;  %s965_s22 = smov 96   ;;  %s966_s10 = smov [#allocation5]  }
   0x7   :  { %162 = vmatpush.bf16.msra.mxu1 %v1032_v3  ;;  %236 = vmatpush.bf16.msra.mxu2 %v1032_v3  ;;  %v1077_v33 = vld [vmem:[%s1183_s0] sm:$0xff]  ;;  %s766_s11 = sshll.u32 %s966_s10, 4  ;;  %s768_s13 = sshll.u32 %s1192_s9, 4  ;;  %s767_s11 = int_to_ptr.vmem [resolvable:$true] %s766_s11  ;;  %s769_s13 = int_to_ptr.hbm [resolvable:$true] %s768_s13 }
   0x8   :  { %305 = vmatpush.bf16.msra.mxu3 %v1032_v3  ;;  %vm213_vm6 = vcmp.gt.s32.totalorder %v1077_v33, 0  ;;  %vm282_vm8 = vcmp.gt.s32.totalorder %v1077_v33, 1  ;;  %vm351_vm9 = vcmp.gt.s32.totalorder %v1077_v33, 2  ;;  %s967_s16 = smov [#allocation3]   ;;  %s757_s4 = sshll.u32 %s1191_s8, 4  ;;  %s758_s4 = int_to_ptr.hbm [resolvable:$true] %s757_s4 }
   0x9   :  { %806 = vmatmul.msk.bf16.vlgmr.msra.gmra.mxu0 %vm82_vm0, %v842_v6  ;;  %v214_v34 = vsel %vm213_vm6, 1, %v963_v4  ;;  %v283_v55 = vsel %vm282_vm8, 1, %v963_v4  ;;  %v352_v57 = vsel %vm351_vm9, 1, %v963_v4  ;;  %vm420_vm6 = vcmp.gt.s32.totalorder %v1077_v33, 3  ;;  %s755_s17 = sshll.u32 %s967_s16, 4  ;;  %s756_s17 = int_to_ptr.vmem [resolvable:$true] %s755_s17 }
   0xa   :  { %163 = vmatmul.bf16.vlgmr.msra.gmra.mxu1 %v963_v4  ;;  %216 = vperm.xlu2 %857, %v214_v34  }
   0xb   :  { %373 = vmatpush.bf16.msrb.mxu1 %v1024_v1  ;;  %442 = vmatpush.bf16.msrb.mxu2 %v1024_v1 }
   0xc   :  { %511 = vmatpush.bf16.msrb.mxu3 %v1024_v1 }
   0xf   :  { %374 = vmatpush.bf16.msrb.mxu1 %v1032_v3  ;;  %443 = vmatpush.bf16.msrb.mxu2 %v1032_v3 }
  0x10   :  { %512 = vmatpush.bf16.msrb.mxu3 %v1032_v3 }
  0x13   :  { %580 = vmatpush.bf16.msra.mxu1 %v1024_v1 }
  0x17   :  { %581 = vmatpush.bf16.msra.mxu1 %v1032_v3 }
  0x64   :  { %v217_v39 = vpop.permute.xlu2 %216 }
  0x65   :  { %vm218_vm7 = vcmp.eq.s32.totalorder %v217_v39, 1 }
  0x78   :  { %v1065_v8 = vpop.permute.xlu0 %190 }
  0x86   :  { %v104_v9 = vpop.f32.mrf.mxu0 }
  0x87   :  { %v164_v10 = vpop.f32.mrf.mxu1  ;;  %v105_v11 = vadd.f32 %v1063_v7, %v104_v9 }
  0x88   :  { %v193_v12 = vadd.f32 %v1065_v8, %v164_v10 }
  0x89   :  { %125 = vst.msk [vmem:[#allocation2] sm:$0xff] %vm124_vm1, %v105_v11  ;;  %v843_v11 = vld [vmem:[%s1184_s1 + $0x8] sm:$0xff] }
  0x8a   :  { %195 = vrot.lane.b32.xlu0 %v193_v12, %s964_s2  ;;  %807 = vmatmul.msk.bf16.gmra.mxu0 %vm82_vm0, %v843_v11 }
  0x8e   :  { %v106_v14 = vpop.f32.mrf.mxu0 }
  0x8f   :  { %v166_v13 = vpop.f32.mrf.mxu1  ;;  %v107_v15 = vadd.f32 %v1063_v7, %v106_v14 }
  0x90   :  { %v139_v16 = vld [vmem:[#allocation2] sm:$0xff] }
  0x91   :  { %126 = vst.msk [vmem:[#allocation2 + $0x8] sm:$0xff] %vm124_vm1, %v107_v15  ;;  %v168_v17 = vadd.f32 %v164_v10, %v139_v16 }
  0x93   :  { %v818_v18 = vmul.f32 -1.442695, %v168_v17 }
  0x95   :  { %863 = vpow2.f32 %v818_v18 }
  0x98   :  { %v221_v50 = vld [vmem:[#allocation2 + $0x8] sm:$0xff] }
  0x9b   :  { %v864_v19 = vpop.eup %863 }
  0x9c   :  { %v172_v20 = vadd.f32 1.0, %v864_v19 }
  0x9e   :  { %865 = vrcp.f32 %v172_v20  ;;  %v184_v26 = vand.u32 2147483648, %v172_v20  ;;  %vm178_vm3 = vweird.f32 %v172_v20  ;;  %v182_v27 = vand.u32 2147483647, %v172_v20 }
  0xa0   :  { %v185_v29 = vor.u32 1.1754944e-38, %v184_v26  ;;  %vm183_vm5 = vcmp.eq.f32.partialorder %v182_v27, 8.507059e+37 }
  0xa4   :  { %v866_v21 = vpop.eup %865 }
  0xa5   :  { %v174_v22 = vmul.f32 %v866_v21, %v172_v20  ;;  %vm179_vm2 = vweird.f32 %v866_v21 }
  0xa6   :  { %vm180_vm4 = vmor %vm178_vm3, %vm179_vm2 }
  0xa7   :  { %v175_v23 = vsub.f32 1.0, %v174_v22 }
  0xa9   :  { %v176_v24 = vmul.f32 %v866_v21, %v175_v23 }
  0xab   :  { %v177_v25 = vadd.f32 %v866_v21, %v176_v24 }
  0xad   :  { %v181_v28 = vsel %vm180_vm4, %v866_v21, %v177_v25 }
  0xae   :  { %v186_v31 = vsel %vm183_vm5, %v185_v29, %v181_v28 }
  0xaf   :  { %v205_v38 = vsub.f32 1.0, %v186_v31  ;;  %v211_v41 = vmul.f32 0.0, %v186_v31 }
  0xfc   :  { %v196_v30 = vpop.permute.xlu0 %195 }
  0xfd   :  { %v198_v32 = vmul.f32 %v196_v30, %v186_v31 }
  0xff   :  { %200 = vrot.lane.b32.xlu1 %v198_v32, %s964_s2 }
 0x107   :  { %v109_v20 = vpop.f32.mrf.mxu0 }
 0x108   :  { %v110_v21 = vadd.f32 %v1063_v7, %v109_v20 }
 0x10a   :  { %127 = vst.msk [vmem:[#allocation2 + $0x10] sm:$0xff] %vm124_vm1, %v110_v21  ;;  %v844_v21 = vld [vmem:[%s1184_s1 + $0x10] sm:$0xff] }
 0x10b   :  { %808 = vmatmul.msk.bf16.gmra.mxu0 %vm82_vm0, %v844_v21 }
 0x10f   :  { %v111_v23 = vpop.f32.mrf.mxu0 }
 0x110   :  { %v112_v24 = vadd.f32 %v1063_v7, %v111_v23 }
 0x111   :  { %v290_v28 = vld [vmem:[#allocation2 + $0x10] sm:$0xff] }
 0x112   :  { %128 = vst.msk [vmem:[#allocation2 + $0x18] sm:$0xff] %vm124_vm1, %v112_v24 }
 0x171   :  { %v201_v35 = vpop.permute.xlu1 %200 }
 0x172   :  { %v203_v36 = vadd.f32 %v201_v35, %v139_v16 }
 0x174   :  { %867 = vtanh.f32 %v203_v36 }
 0x17a   :  { %v868_v37 = vpop.eup %867 }
 0x17b   :  { %207 = vrot.lane.b32.xlu1 %v868_v37, %s965_s22 }
 0x1ed   :  { %v208_v40 = vpop.permute.xlu1 %207 }
 0x1ee   :  { %v210_v42 = vmul.f32 %v208_v40, %v205_v38 }
 0x1f0   :  { %v212_v43 = vadd.f32 %v211_v41, %v210_v42 }
 0x1f2   :  { %v219_v44 = vsel %vm218_vm7, %v212_v43, 0.0 }
 0x1f3   :  { %v222_v45 = vpack.c.bf16 %v219_v44, %v219_v44 }
 0x1f5   :  { %224 = vrot.lane.b32.xlu2 %v222_v45, %s965_s22 }
 0x24f   :  { %v225_v46 = vpop.permute.xlu2 %224 }
 0x250   :  { %819 = vmatmul.msk.bf16.vlgmr.msra.gmra.mxu2 %vm82_vm0, %v225_v46 }
 0x251   :  { %649 = vmatpush.bf16.msra.mxu2 %v1024_v1 }
 0x255   :  { %650 = vmatpush.bf16.msra.mxu2 %v1032_v3 }
 0x2d3   :  { %v238_v47 = vpop.f32.mrf.mxu2 }
 0x2d4   :  { %v262_v48 = vadd.f32 %v238_v47, %v1065_v8  ;;  %v242_v51 = vadd.f32 %v238_v47, %v221_v50 }
 0x2d6   :  { %264 = vrot.lane.b32.xlu0 %v262_v48, %s964_s2  ;;  %v820_v52 = vmul.f32 -1.442695, %v242_v51 }
 0x2d8   :  { %869 = vpow2.f32 %v820_v52 }
 0x2db   :  { %v240_v49 = vpop.f32.mrf.mxu2 }
 0x2de   :  { %v870_v53 = vpop.eup %869  ;;  %285 = vperm.xlu0 %858, %v283_v55  }
 0x2df   :  { %v246_v54 = vadd.f32 1.0, %v870_v53 }
 0x2e1   :  { %871 = vrcp.f32 %v246_v54  ;;  %v258_v62 = vand.u32 2147483648, %v246_v54  ;;  %vm252_vm11 = vweird.f32 %v246_v54  ;;  %v256_v63 = vand.u32 2147483647, %v246_v54 }
 0x2e3   :  { %v259_v1 = vor.u32 1.1754944e-38, %v258_v62  ;;  %vm257_vm13 = vcmp.eq.f32.partialorder %v256_v63, 8.507059e+37  ;;  %v359_v62 = vld [vmem:[#allocation2 + $0x18] sm:$0xff] }
 0x2e6   :  { %354 = vperm.xlu0 %858, %v352_v57  }
 0x2e7   :  { %v872_v56 = vpop.eup %871 }
 0x2e8   :  { %v248_v58 = vmul.f32 %v872_v56, %v246_v54  ;;  %vm253_vm10 = vweird.f32 %v872_v56 }
 0x2e9   :  { %vm254_vm12 = vmor %vm252_vm11, %vm253_vm10 }
 0x2ea   :  { %v249_v59 = vsub.f32 1.0, %v248_v58 }
 0x2ec   :  { %v250_v60 = vmul.f32 %v872_v56, %v249_v59 }
 0x2ee   :  { %v251_v61 = vadd.f32 %v872_v56, %v250_v60 }
 0x2f0   :  { %v255_v0 = vsel %vm254_vm12, %v872_v56, %v251_v61  ;;  %v421_v61 = vsel %vm420_vm6, 1, %v963_v4 }
 0x2f1   :  { %v260_v3 = vsel %vm257_vm13, %v259_v1, %v255_v0 }
 0x2f2   :  { %v274_v12 = vsub.f32 1.0, %v260_v3  ;;  %v280_v15 = vmul.f32 %v260_v3, %v219_v44 }
 0x348   :  { %v265_v2 = vpop.permute.xlu0 %264 }
 0x349   :  { %v267_v5 = vmul.f32 %v265_v2, %v260_v3 }
 0x34b   :  { %269 = vrot.lane.b32.xlu1 %v267_v5, %s964_s2 }
 0x350   :  { %v286_v14 = vpop.permute.xlu0 %285 }
 0x351   :  { %vm287_vm14 = vcmp.eq.s32.totalorder %v286_v14, 1 }
 0x358   :  { %v355_v51 = vpop.permute.xlu0 %354 }
 0x359   :  { %vm356_vm5 = vcmp.eq.s32.totalorder %v355_v51, 1 }
 0x3bd   :  { %v270_v6 = vpop.permute.xlu1 %269 }
 0x3be   :  { %v272_v9 = vadd.f32 %v270_v6, %v221_v50 }
 0x3c0   :  { %873 = vtanh.f32 %v272_v9 }
 0x3c6   :  { %v874_v10 = vpop.eup %873 }
 0x3c7   :  { %276 = vrot.lane.b32.xlu2 %v874_v10, %s965_s22 }
 0x421   :  { %v277_v13 = vpop.permute.xlu2 %276 }
 0x422   :  { %v279_v16 = vmul.f32 %v277_v13, %v274_v12 }
 0x424   :  { %v281_v17 = vadd.f32 %v280_v15, %v279_v16 }
 0x426   :  { %v288_v18 = vsel %vm287_vm14, %v281_v17, %v219_v44 }
 0x427   :  { %v291_v19 = vpack.c.bf16 %v288_v18, %v288_v18 }
 0x429   :  { %293 = vrot.lane.b32.xlu1 %v291_v19, %s965_s22 }
 0x49b   :  { %v294_v22 = vpop.permute.xlu1 %293 }
 0x49c   :  { %821 = vmatmul.msk.bf16.vlgmr.msra.gmra.mxu3 %vm82_vm0, %v294_v22 }
 0x51f   :  { %v307_v25 = vpop.f32.mrf.mxu3 }
 0x520   :  { %v331_v26 = vadd.f32 %v307_v25, %v1065_v8  ;;  %v311_v29 = vadd.f32 %v307_v25, %v290_v28 }
 0x522   :  { %333 = vrot.lane.b32.xlu2 %v331_v26, %s964_s2  ;;  %v822_v30 = vmul.f32 -1.442695, %v311_v29 }
 0x524   :  { %875 = vpow2.f32 %v822_v30  ;;  %v114_v30 = vpop.f32.mrf.mxu0 }
 0x527   :  { %v309_v27 = vpop.f32.mrf.mxu3 }
 0x52a   :  { %v876_v31 = vpop.eup %875 }
 0x52b   :  { %v315_v32 = vadd.f32 1.0, %v876_v31  ;;  %v115_v31 = vadd.f32 %v1063_v7, %v114_v30 }
 0x52d   :  { %877 = vrcp.f32 %v315_v32  ;;  %v327_v39 = vand.u32 2147483648, %v315_v32  ;;  %vm321_vm2 = vweird.f32 %v315_v32  ;;  %v325_v40 = vand.u32 2147483647, %v315_v32  ;;  %129 = vst.msk [vmem:[#allocation2 + $0x20] sm:$0xff] %vm124_vm1, %v115_v31 }
 0x52f   :  { %v328_v42 = vor.u32 1.1754944e-38, %v327_v39  ;;  %vm326_vm4 = vcmp.eq.f32.partialorder %v325_v40, 8.507059e+37 }
 0x533   :  { %v878_v34 = vpop.eup %877 }
 0x534   :  { %v317_v35 = vmul.f32 %v878_v34, %v315_v32  ;;  %vm322_vm15 = vweird.f32 %v878_v34  ;;  %v428_v39 = vld [vmem:[#allocation2 + $0x20] sm:$0xff] }
 0x535   :  { %vm323_vm3 = vmor %vm321_vm2, %vm322_vm15  ;;  %vm489_vm2 = vcmp.gt.s32.totalorder %v1077_v33, 4 }
 0x536   :  { %v318_v36 = vsub.f32 1.0, %v317_v35 }
 0x538   :  { %v319_v37 = vmul.f32 %v878_v34, %v318_v36 }
 0x53a   :  { %v320_v38 = vadd.f32 %v878_v34, %v319_v37 }
 0x53c   :  { %v324_v41 = vsel %vm323_vm3, %v878_v34, %v320_v38  ;;  %v116_v34 = vpop.f32.mrf.mxu0 }
 0x53d   :  { %v329_v44 = vsel %vm326_vm4, %v328_v42, %v324_v41  ;;  %v117_v35 = vadd.f32 %v1063_v7, %v116_v34  ;;  %vm558_vm4 = vcmp.gt.s32.totalorder %v1077_v33, 5 }
 0x53e   :  { %v343_v49 = vsub.f32 1.0, %v329_v44  ;;  %v349_v52 = vmul.f32 %v329_v44, %v288_v18 }
 0x53f   :  { %130 = vst.msk [vmem:[#allocation2 + $0x28] sm:$0xff] %vm124_vm1, %v117_v35 }
 0x57c   :  { %v334_v43 = vpop.permute.xlu2 %333 }
 0x57d   :  { %v336_v45 = vmul.f32 %v334_v43, %v329_v44 }
 0x57f   :  { %338 = vrot.lane.b32.xlu1 %v336_v45, %s964_s2 }
 0x5f1   :  { %v339_v46 = vpop.permute.xlu1 %338 }
 0x5f2   :  { %v341_v47 = vadd.f32 %v339_v46, %v290_v28 }
 0x5f4   :  { %879 = vtanh.f32 %v341_v47 }
 0x5fa   :  { %v880_v48 = vpop.eup %879 }
 0x5fb   :  { %345 = vrot.lane.b32.xlu2 %v880_v48, %s965_s22 }
 0x655   :  { %v346_v50 = vpop.permute.xlu2 %345 }
 0x656   :  { %v348_v53 = vmul.f32 %v346_v50, %v343_v49 }
 0x658   :  { %v350_v54 = vadd.f32 %v349_v52, %v348_v53 }
 0x65a   :  { %v357_v55 = vsel %vm356_vm5, %v350_v54, %v288_v18 }
 0x65b   :  { %v360_v56 = vpack.c.bf16 %v357_v55, %v357_v55 }
 0x65d   :  { %362 = vrot.lane.b32.xlu1 %v360_v56, %s965_s22  ;;  %v490_v56 = vsel %vm489_vm2, 1, %v963_v4 }
 0x6cf   :  { %v363_v57 = vpop.permute.xlu1 %362 }
 0x6d0   :  { %823 = vmatmul.msk.bf16.vlgmr.msrb.gmra.mxu1 %vm82_vm0, %v363_v57 }
 0x74d   :  { %v376_v58 = vpop.f32.mrf.mxu1 }
 0x74e   :  { %v400_v59 = vadd.f32 %v376_v58, %v1065_v8  ;;  %v380_v63 = vadd.f32 %v376_v58, %v359_v62 }
 0x750   :  { %402 = vrot.lane.b32.xlu2 %v400_v59, %s964_s2  ;;  %v824_v0 = vmul.f32 -1.442695, %v380_v63 }
 0x752   :  { %881 = vpow2.f32 %v824_v0 }
 0x755   :  { %v378_v60 = vpop.f32.mrf.mxu1 }
 0x758   :  { %423 = vperm.xlu2 %857, %v421_v61   ;;  %v882_v1 = vpop.eup %881 }
 0x759   :  { %v384_v2 = vadd.f32 1.0, %v882_v1 }
 0x75b   :  { %883 = vrcp.f32 %v384_v2  ;;  %v396_v11 = vand.u32 2147483648, %v384_v2  ;;  %vm390_vm8 = vweird.f32 %v384_v2  ;;  %v394_v12 = vand.u32 2147483647, %v384_v2 }
 0x75d   :  { %v397_v14 = vor.u32 1.1754944e-38, %v396_v11  ;;  %vm395_vm10 = vcmp.eq.f32.partialorder %v394_v12, 8.507059e+37  ;;  %v559_v11 = vsel %vm558_vm4, 1, %v963_v4  ;;  %v497_v12 = vld [vmem:[#allocation2 + $0x28] sm:$0xff] }
 0x761   :  { %v884_v3 = vpop.eup %883 }
 0x762   :  { %v386_v5 = vmul.f32 %v884_v3, %v384_v2  ;;  %vm391_vm7 = vweird.f32 %v884_v3 }
 0x763   :  { %vm392_vm9 = vmor %vm390_vm8, %vm391_vm7 }
 0x764   :  { %v387_v6 = vsub.f32 1.0, %v386_v5 }
 0x766   :  { %v388_v9 = vmul.f32 %v884_v3, %v387_v6 }
 0x768   :  { %v389_v10 = vadd.f32 %v884_v3, %v388_v9 }
 0x76a   :  { %v393_v13 = vsel %vm392_vm9, %v884_v3, %v389_v10 }
 0x76b   :  { %v398_v16 = vsel %vm395_vm10, %v397_v14, %v393_v13  ;;  %vm627_vm10 = vcmp.gt.s32.totalorder %v1077_v33, 6 }
 0x76c   :  { %v412_v22 = vsub.f32 1.0, %v398_v16  ;;  %v418_v25 = vmul.f32 %v398_v16, %v357_v55 }
 0x7aa   :  { %v403_v15 = vpop.permute.xlu2 %402 }
 0x7ab   :  { %v405_v17 = vmul.f32 %v403_v15, %v398_v16 }
 0x7ad   :  { %407 = vrot.lane.b32.xlu0 %v405_v17, %s964_s2 }
 0x7b2   :  { %v424_v24 = vpop.permute.xlu2 %423 }
 0x7b3   :  { %vm425_vm11 = vcmp.eq.s32.totalorder %v424_v24, 1 }
 0x81f   :  { %v408_v18 = vpop.permute.xlu0 %407 }
 0x820   :  { %v410_v19 = vadd.f32 %v408_v18, %v359_v62 }
 0x822   :  { %885 = vtanh.f32 %v410_v19 }
 0x828   :  { %v886_v20 = vpop.eup %885 }
 0x829   :  { %414 = vrot.lane.b32.xlu1 %v886_v20, %s965_s22 }
 0x89b   :  { %v415_v23 = vpop.permute.xlu1 %414 }
 0x89c   :  { %v417_v26 = vmul.f32 %v415_v23, %v412_v22 }
 0x89e   :  { %v419_v27 = vadd.f32 %v418_v25, %v417_v26 }
 0x8a0   :  { %v426_v28 = vsel %vm425_vm11, %v419_v27, %v357_v55 }
 0x8a1   :  { %v429_v29 = vpack.c.bf16 %v426_v28, %v426_v28 }
 0x8a3   :  { %431 = vrot.lane.b32.xlu0 %v429_v29, %s965_s22 }
 0x915   :  { %v432_v32 = vpop.permute.xlu0 %431 }
 0x916   :  { %825 = vmatmul.msk.bf16.vlgmr.msrb.gmra.mxu2 %vm82_vm0, %v432_v32  ;;  %v845_v32 = vld [vmem:[%s1184_s1 + $0x18] sm:$0xff] }
 0x917   :  { %809 = vmatmul.msk.bf16.gmra.mxu0 %vm82_vm0, %v845_v32 }
 0x999   :  { %v445_v36 = vpop.f32.mrf.mxu2 }
 0x99a   :  { %v469_v37 = vadd.f32 %v445_v36, %v1065_v8  ;;  %v449_v40 = vadd.f32 %v445_v36, %v428_v39 }
 0x99c   :  { %471 = vrot.lane.b32.xlu1 %v469_v37, %s964_s2  ;;  %v826_v41 = vmul.f32 -1.442695, %v449_v40 }
 0x99e   :  { %887 = vpow2.f32 %v826_v41 }
 0x9a1   :  { %v447_v38 = vpop.f32.mrf.mxu2 }
 0x9a4   :  { %v888_v42 = vpop.eup %887  ;;  %492 = vperm.xlu1 %859, %v490_v56  }
 0x9a5   :  { %v453_v43 = vadd.f32 1.0, %v888_v42  ;;  %v119_v42 = vpop.f32.mrf.mxu0 }
 0x9a7   :  { %889 = vrcp.f32 %v453_v43  ;;  %v465_v49 = vand.u32 2147483648, %v453_v43  ;;  %vm459_vm13 = vweird.f32 %v453_v43  ;;  %v463_v50 = vand.u32 2147483647, %v453_v43 }
 0x9a9   :  { %v466_v52 = vor.u32 1.1754944e-38, %v465_v49  ;;  %vm464_vm15 = vcmp.eq.f32.partialorder %v463_v50, 8.507059e+37  ;;  %v628_v50 = vsel %vm627_vm10, 1, %v963_v4 }
 0x9ad   :  { %v890_v44 = vpop.eup %889 }
 0x9ae   :  { %v455_v45 = vmul.f32 %v890_v44, %v453_v43  ;;  %vm460_vm12 = vweird.f32 %v890_v44  ;;  %v120_v43 = vadd.f32 %v1063_v7, %v119_v42 }
 0x9af   :  { %vm461_vm14 = vmor %vm459_vm13, %vm460_vm12 }
 0x9b0   :  { %v456_v46 = vsub.f32 1.0, %v455_v45  ;;  %131 = vst.msk [vmem:[#allocation2 + $0x30] sm:$0xff] %vm124_vm1, %v120_v43  ;;  %v121_v45 = vpop.f32.mrf.mxu0 }
 0x9b2   :  { %v457_v47 = vmul.f32 %v890_v44, %v456_v46  ;;  %v122_v46 = vadd.f32 %v1063_v7, %v121_v45 }
 0x9b4   :  { %v458_v48 = vadd.f32 %v890_v44, %v457_v47  ;;  %132 = vst.msk [vmem:[#allocation2 + $0x38] sm:$0xff] %vm124_vm1, %v122_v46 }
 0x9b6   :  { %v462_v51 = vsel %vm461_vm14, %v890_v44, %v458_v48 }
 0x9b7   :  { %v467_v54 = vsel %vm464_vm15, %v466_v52, %v462_v51  ;;  %v566_v51 = vld [vmem:[#allocation2 + $0x30] sm:$0xff]  ;;  %vm696_vm15 = vcmp.gt.s32.totalorder %v1077_v33, 7 }
 0x9b8   :  { %v481_v60 = vsub.f32 1.0, %v467_v54  ;;  %v487_v63 = vmul.f32 %v467_v54, %v426_v28 }
 0xa0e   :  { %v472_v53 = vpop.permute.xlu1 %471 }
 0xa0f   :  { %v474_v55 = vmul.f32 %v472_v53, %v467_v54 }
 0xa11   :  { %476 = vrot.lane.b32.xlu2 %v474_v55, %s964_s2 }
 0xa16   :  { %v493_v61 = vpop.permute.xlu1 %492 }
 0xa17   :  { %vm494_vm3 = vcmp.eq.s32.totalorder %v493_v61, 1 }
 0xa6b   :  { %v477_v57 = vpop.permute.xlu2 %476 }
 0xa6c   :  { %v479_v58 = vadd.f32 %v477_v57, %v428_v39 }
 0xa6e   :  { %891 = vtanh.f32 %v479_v58 }
 0xa74   :  { %v892_v59 = vpop.eup %891 }
 0xa75   :  { %483 = vrot.lane.b32.xlu0 %v892_v59, %s965_s22 }
 0xae7   :  { %v484_v62 = vpop.permute.xlu0 %483 }
 0xae8   :  { %v486_v0 = vmul.f32 %v484_v62, %v481_v60 }
 0xaea   :  { %v488_v1 = vadd.f32 %v487_v63, %v486_v0 }
 0xaec   :  { %v495_v2 = vsel %vm494_vm3, %v488_v1, %v426_v28 }
 0xaed   :  { %v498_v3 = vpack.c.bf16 %v495_v2, %v495_v2 }
 0xaef   :  { %500 = vrot.lane.b32.xlu2 %v498_v3, %s965_s22 }
 0xb49   :  { %v501_v5 = vpop.permute.xlu2 %500 }
 0xb4a   :  { %827 = vmatmul.msk.bf16.vlgmr.msrb.gmra.mxu3 %vm82_vm0, %v501_v5 }
 0xbcd   :  { %v514_v6 = vpop.f32.mrf.mxu3 }
 0xbce   :  { %v538_v9 = vadd.f32 %v514_v6, %v1065_v8  ;;  %v518_v13 = vadd.f32 %v514_v6, %v497_v12 }
 0xbd0   :  { %540 = vrot.lane.b32.xlu0 %v538_v9, %s964_s2  ;;  %v828_v14 = vmul.f32 -1.442695, %v518_v13 }
 0xbd2   :  { %893 = vpow2.f32 %v828_v14 }
 0xbd5   :  { %v516_v10 = vpop.f32.mrf.mxu3 }
 0xbd8   :  { %561 = vperm.xlu0 %858, %v559_v11   ;;  %v894_v15 = vpop.eup %893 }
 0xbd9   :  { %v522_v16 = vadd.f32 1.0, %v894_v15 }
 0xbdb   :  { %895 = vrcp.f32 %v522_v16  ;;  %v534_v22 = vand.u32 2147483648, %v522_v16  ;;  %vm528_vm6 = vweird.f32 %v522_v16  ;;  %v532_v23 = vand.u32 2147483647, %v522_v16 }
 0xbdd   :  { %v535_v25 = vor.u32 1.1754944e-38, %v534_v22  ;;  %vm533_vm8 = vcmp.eq.f32.partialorder %v532_v23, 8.507059e+37  ;;  %v635_v22 = vld [vmem:[#allocation2 + $0x38] sm:$0xff] }
 0xbe1   :  { %v896_v17 = vpop.eup %895 }
 0xbe2   :  { %v524_v18 = vmul.f32 %v896_v17, %v522_v16  ;;  %vm529_vm5 = vweird.f32 %v896_v17 }
 0xbe3   :  { %vm530_vm7 = vmor %vm528_vm6, %vm529_vm5 }
 0xbe4   :  { %v525_v19 = vsub.f32 1.0, %v524_v18 }
 0xbe6   :  { %v526_v20 = vmul.f32 %v896_v17, %v525_v19 }
 0xbe8   :  { %v527_v21 = vadd.f32 %v896_v17, %v526_v20 }
 0xbea   :  { %v531_v24 = vsel %vm530_vm7, %v896_v17, %v527_v21  ;;  %v697_v21 = vsel %vm696_vm15, 1, %v963_v4  ;;  %vm748_vm7 = vcmask 130048  }
 0xbeb   :  { %v536_v27 = vsel %vm533_vm8, %v535_v25, %v531_v24 }
 0xbec   :  { %v550_v34 = vsub.f32 1.0, %v536_v27  ;;  %v556_v37 = vmul.f32 %v536_v27, %v495_v2 }
 0xc42   :  { %v541_v26 = vpop.permute.xlu0 %540 }
 0xc43   :  { %v543_v28 = vmul.f32 %v541_v26, %v536_v27 }
 0xc45   :  { %545 = vrot.lane.b32.xlu1 %v543_v28, %s964_s2 }
 0xc4a   :  { %v562_v36 = vpop.permute.xlu0 %561 }
 0xc4b   :  { %vm563_vm9 = vcmp.eq.s32.totalorder %v562_v36, 1 }
 0xcb7   :  { %v546_v29 = vpop.permute.xlu1 %545 }
 0xcb8   :  { %v548_v30 = vadd.f32 %v546_v29, %v497_v12 }
 0xcba   :  { %897 = vtanh.f32 %v548_v30 }
 0xcc0   :  { %v898_v31 = vpop.eup %897 }
 0xcc1   :  { %552 = vrot.lane.b32.xlu2 %v898_v31, %s965_s22 }
 0xd1b   :  { %v553_v35 = vpop.permute.xlu2 %552 }
 0xd1c   :  { %v555_v38 = vmul.f32 %v553_v35, %v550_v34 }
 0xd1e   :  { %v557_v39 = vadd.f32 %v556_v37, %v555_v38 }
 0xd20   :  { %v564_v40 = vsel %vm563_vm9, %v557_v39, %v495_v2 }
 0xd21   :  { %v567_v41 = vpack.c.bf16 %v564_v40, %v564_v40 }
 0xd23   :  { %569 = vrot.lane.b32.xlu1 %v567_v41, %s965_s22  ;;  %v850_v41 = vld [vmem:[%s1189_s6] sm:$0xff] }
 0xd95   :  { %v570_v44 = vpop.permute.xlu1 %569 }
 0xd96   :  { %829 = vmatmul.msk.bf16.vlgmr.msra.gmra.mxu1 %vm82_vm0, %v570_v44 }
 0xe13   :  { %v583_v47 = vpop.f32.mrf.mxu1 }
 0xe14   :  { %v607_v48 = vadd.f32 %v583_v47, %v1065_v8  ;;  %v587_v52 = vadd.f32 %v583_v47, %v566_v51 }
 0xe16   :  { %609 = vrot.lane.b32.xlu2 %v607_v48, %s964_s2  ;;  %v830_v53 = vmul.f32 -1.442695, %v587_v52  ;;  %v862_v52 = vld [vmem:[%s1190_s7] ss:$0 sm:$0xff] }
 0xe18   :  { %899 = vpow2.f32 %v830_v53 }
 0xe1b   :  { %v585_v49 = vpop.f32.mrf.mxu1 }
 0xe1e   :  { %630 = vperm.xlu2 %857, %v628_v50   ;;  %v900_v54 = vpop.eup %899 }
 0xe1f   :  { %v591_v55 = vadd.f32 1.0, %v900_v54 }
 0xe21   :  { %901 = vrcp.f32 %v591_v55  ;;  %v603_v60 = vand.u32 2147483648, %v591_v55  ;;  %vm597_vm11 = vweird.f32 %v591_v55  ;;  %v601_v61 = vand.u32 2147483647, %v591_v55 }
 0xe23   :  { %v604_v63 = vor.u32 1.1754944e-38, %v603_v60  ;;  %vm602_vm13 = vcmp.eq.f32.partialorder %v601_v61, 8.507059e+37 }
 0xe27   :  { %v902_v7 = vpop.eup %901 }
 0xe28   :  { %v593_v56 = vmul.f32 %v902_v7, %v591_v55  ;;  %vm598_vm1 = vweird.f32 %v902_v7 }
 0xe29   :  { %vm599_vm12 = vmor %vm597_vm11, %vm598_vm1 }
 0xe2a   :  { %v594_v57 = vsub.f32 1.0, %v593_v56 }
 0xe2c   :  { %v595_v58 = vmul.f32 %v902_v7, %v594_v57 }
 0xe2e   :  { %v596_v59 = vadd.f32 %v902_v7, %v595_v58 }
 0xe30   :  { %v600_v62 = vsel %vm599_vm12, %v902_v7, %v596_v59 }
 0xe31   :  { %v605_v1 = vsel %vm602_vm13, %v604_v63, %v600_v62 }
 0xe32   :  { %v619_v9 = vsub.f32 1.0, %v605_v1  ;;  %v625_v12 = vmul.f32 %v605_v1, %v564_v40 }
 0xe70   :  { %v610_v0 = vpop.permute.xlu2 %609 }
 0xe71   :  { %v612_v2 = vmul.f32 %v610_v0, %v605_v1 }
 0xe73   :  { %614 = vrot.lane.b32.xlu0 %v612_v2, %s964_s2 }
 0xe78   :  { %v631_v11 = vpop.permute.xlu2 %630 }
 0xe79   :  { %vm632_vm14 = vcmp.eq.s32.totalorder %v631_v11, 1 }
 0xee5   :  { %v615_v3 = vpop.permute.xlu0 %614 }
 0xee6   :  { %v617_v5 = vadd.f32 %v615_v3, %v566_v51 }
 0xee8   :  { %903 = vtanh.f32 %v617_v5 }
 0xeee   :  { %v904_v6 = vpop.eup %903 }
 0xeef   :  { %621 = vrot.lane.b32.xlu1 %v904_v6, %s965_s22 }
 0xf61   :  { %v622_v10 = vpop.permute.xlu1 %621 }
 0xf62   :  { %v624_v13 = vmul.f32 %v622_v10, %v619_v9 }
 0xf64   :  { %v626_v14 = vadd.f32 %v625_v12, %v624_v13 }
 0xf66   :  { %v633_v15 = vsel %vm632_vm14, %v626_v14, %v564_v40  ;;  %v851_v40 = vld [vmem:[%s1189_s6 + $0x8] sm:$0xff] }
 0xf67   :  { %v636_v16 = vpack.c.bf16 %v633_v15, %v633_v15  ;;  %741 = vmatpush.bf16.msra.mxu3 %v851_v40 }
 0xf69   :  { %638 = vrot.lane.b32.xlu0 %v636_v16, %s965_s22 }
 0xf6b   :  { %742 = vmatpush.bf16.msra.mxu3 %v850_v41 }
 0xfdb   :  { %v639_v17 = vpop.permute.xlu0 %638 }
 0xfdc   :  { %831 = vmatmul.msk.bf16.vlgmr.msra.gmra.mxu2 %vm82_vm0, %v639_v17 }
0x105f   :  { %v652_v18 = vpop.f32.mrf.mxu2 }
0x1060   :  { %v676_v19 = vadd.f32 %v652_v18, %v1065_v8  ;;  %v656_v23 = vadd.f32 %v652_v18, %v635_v22 }
0x1062   :  { %678 = vrot.lane.b32.xlu1 %v676_v19, %s964_s2  ;;  %v832_v24 = vmul.f32 -1.442695, %v656_v23 }
0x1064   :  { %905 = vpow2.f32 %v832_v24 }
0x1067   :  { %v654_v20 = vpop.f32.mrf.mxu2 }
0x106a   :  { %699 = vperm.xlu1 %859, %v697_v21   ;;  %v906_v25 = vpop.eup %905 }
0x106b   :  { %v660_v26 = vadd.f32 1.0, %v906_v25 }
0x106d   :  { %907 = vrcp.f32 %v660_v26  ;;  %v672_v31 = vand.u32 2147483648, %v660_v26  ;;  %vm666_vm3 = vweird.f32 %v660_v26  ;;  %v670_v33 = vand.u32 2147483647, %v660_v26 }
0x106f   :  { %v673_v4 = vor.u32 1.1754944e-38, %v672_v31  ;;  %vm671_vm5 = vcmp.eq.f32.partialorder %v670_v33, 8.507059e+37 }
0x1073   :  { %v908_v27 = vpop.eup %907 }
0x1074   :  { %v662_v28 = vmul.f32 %v908_v27, %v660_v26  ;;  %vm667_vm2 = vweird.f32 %v908_v27 }
0x1075   :  { %vm668_vm4 = vmor %vm666_vm3, %vm667_vm2 }
0x1076   :  { %v663_v29 = vsub.f32 1.0, %v662_v28 }
0x1078   :  { %v664_v30 = vmul.f32 %v908_v27, %v663_v29 }
0x107a   :  { %v665_v8 = vadd.f32 %v908_v27, %v664_v30 }
0x107c   :  { %v669_v32 = vsel %vm668_vm4, %v908_v27, %v665_v8 }
0x107d   :  { %v674_v35 = vsel %vm671_vm5, %v673_v4, %v669_v32 }
0x107e   :  { %v688_v42 = vsub.f32 1.0, %v674_v35  ;;  %v694_v45 = vmul.f32 %v674_v35, %v633_v15 }
0x10d4   :  { %v679_v34 = vpop.permute.xlu1 %678 }
0x10d5   :  { %v681_v36 = vmul.f32 %v679_v34, %v674_v35 }
0x10d7   :  { %683 = vrot.lane.b32.xlu2 %v681_v36, %s964_s2 }
0x10dc   :  { %v700_v44 = vpop.permute.xlu1 %699 }
0x10dd   :  { %vm701_vm6 = vcmp.eq.s32.totalorder %v700_v44, 1 }
0x1131   :  { %v684_v37 = vpop.permute.xlu2 %683 }
0x1132   :  { %v686_v38 = vadd.f32 %v684_v37, %v635_v22 }
0x1134   :  { %909 = vtanh.f32 %v686_v38 }
0x113a   :  { %v910_v39 = vpop.eup %909 }
0x113b   :  { %690 = vrot.lane.b32.xlu0 %v910_v39, %s965_s22 }
0x11ad   :  { %v691_v43 = vpop.permute.xlu0 %690 }
0x11ae   :  { %v693_v46 = vmul.f32 %v691_v43, %v688_v42 }
0x11b0   :  { %v695_v47 = vadd.f32 %v694_v45, %v693_v46 }
0x11b2   :  { %v702_v48 = vsel %vm701_vm6, %v695_v47, %v633_v15 }
0x11b3   :  { %704 = vrot.lane.b32.xlu0 %v702_v48, %s965_s22  ;;  %v708_v49 = vpack.c.bf16 %v702_v48, %v702_v48 }
0x11b5   :  { %718 = vrot.lane.b32.xlu2 %v708_v49, %s965_s22 }
0x120f   :  { %v719_v50 = vpop.permute.xlu2 %718 }
0x1210   :  { %841 = vmatmul.msk.bf16.vlgmr.msra.gmra.mxu3 %vm82_vm0, %v719_v50 }
0x1225   :  { %v705_v51 = vpop.permute.xlu0 %704 }
0x1226   :  { %707 = vst.msk [vmem:[#allocation5] sm:$0xff] %vm82_vm0, %v705_v51 }
0x1227   :  { %771 = dma.vmem_to_hbm [thread:$0]  %s767_s11, 128, %s769_s13, [#allocation6]  }
0x1293   :  { %v744_v53 = vpop.f32.mrf.mxu3 }
0x1294   :  { %v745_v54 = vadd.f32 %v862_v52, %v744_v53 }
0x1296   :  { %749 = vst.msk [vmem:[#allocation3] sm:$0xff] %vm748_vm7, %v745_v54 }
0x1297   :  { %760 = dma.vmem_to_hbm [thread:$0]  %s756_s17, 128, %s758_s4, [#allocation4]  }
0x129b   :  { %v746_v55 = vpop.f32.mrf.mxu3 }
0x129c   :  { %959 = dma.done.wait [#allocation4], 128  }
0x129d   :  { %960 = vsyncadd [#allocation4], 4294967168 }
0x129e   :  { %961 = dma.done.wait [#allocation6], 128  }
0x129f   :  { %962 = vsyncadd [#allocation6], 4294967168 }
0x12a0   :  { %780 = vsyncpa [#allocation4], 1 }
0x12a1   :  { %781 = vsyncpa [#allocation6], 1 }

</bundles_post_ra>
